<compile_context>
chip_gen: v5e
topology: v5e:2x2
jax: 0.10.0
libtpu: 0.0.40
codegen_flags: <defaults>
</compile_context>

<pallas_src>
import functools
import math

import jax
import jax.numpy as jnp
from jax.experimental import pallas as pl
from jax.experimental.pallas import tpu as pltpu


def _tconv_kernel(x_ref, w_ref, o_ref, *, seq_len):
    """One batch element.

    x_ref: (1, M, Cin) with M = V*seq_len, row index = v*seq_len + t
    w_ref: (3, Cin, Nout)   [tap, C_in, C_out(lane-padded)]
    o_ref: (1, M, Nout)
    """
    x = x_ref[0]                                          # (M, Cin)
    m, c_in = x.shape

    # Shift along time (sublane axis) to get the t-1 / t+1 rows.
    zrow = jnp.zeros((1, c_in), x.dtype)
    x_prev = jnp.concatenate([zrow, x[:-1, :]], axis=0)
    x_next = jnp.concatenate([x[1:, :], zrow], axis=0)

    # Zero the rows that correspond to the conv's zero padding (t == 0 for the
    # previous tap, t == T-1 for the next tap).  Because V is folded into M,
    # this mask also prevents mixing across joint boundaries.
    t = jax.lax.broadcasted_iota(jnp.int32, x.shape, 0) % seq_len
    x_prev = jnp.where(t == 0, 0.0, x_prev)
    x_next = jnp.where(t == seq_len - 1, 0.0, x_next)

    y = jnp.dot(x_prev, w_ref[0], preferred_element_type=jnp.float32)
    y = y + jnp.dot(x, w_ref[1], preferred_element_type=jnp.float32)
    y = y + jnp.dot(x_next, w_ref[2], preferred_element_type=jnp.float32)
    o_ref[0] = y


def simple_tconv(x, weight, *, lane_multiple=128):
    """Pallas SimpleTConv forward.

    x:      [B, C, T, V] float32 (PyTorch NCHW-style layout)
    weight: [C_out, C_in, 3, 1]  (PyTorch Conv2d layout), bias-free
    returns [B, C_out, T, V]
    """
    B, C, T, V = x.shape
    c_out = weight.shape[0]

    # Weights -> [tap, C_in, C_out] matmul layout, zero-padded along C_out to a
    # lane-dense width (a one-time, init-cost transform in a real model).
    w = jnp.transpose(weight[:, :, :, 0], (2, 1, 0))      # (3, C_in, C_out)
    n_out = pl.cdiv(c_out, lane_multiple) * lane_multiple
    w = jnp.pad(w, ((0, 0), (0, 0), (0, n_out - c_out)))

    # Channels-last; fold joints into the matmul M dimension (row = v*T + t).
    xm = jnp.transpose(x, (0, 3, 2, 1)).reshape(B, V * T, C)

    out = pl.pallas_call(
        functools.partial(_tconv_kernel, seq_len=T),
        grid=(B,),
        in_specs=[pl.BlockSpec((1, V * T, C), lambda b: (b, 0, 0)),
                  pl.BlockSpec((3, C, n_out), lambda b: (0, 0, 0))],
        out_specs=pl.BlockSpec((1, V * T, n_out), lambda b: (b, 0, 0)),
        out_shape=jax.ShapeDtypeStruct((B, V * T, n_out), jnp.float32),
        compiler_params=pltpu.CompilerParams(
            dimension_semantics=("parallel",)),
    )(xm, w)

    # Drop lane padding and return to the PyTorch [B, C_out, T, V] layout
    # (slice + reshape + transpose are fused by XLA).
    return out[:, :, :c_out].reshape(B, V, T, c_out).transpose(0, 3, 2, 1)


if __name__ == "__main__":
    B, C, T, V = 2, 32, 16, 4
    key = jax.random.PRNGKey(0)
    kx, kw = jax.random.split(key)
    x = jax.random.normal(kx, (B, C, T, V), jnp.float32)

    # PyTorch Conv2d default init: uniform(-1/sqrt(fan_in), 1/sqrt(fan_in)).
    fan_in = C * 3 * 1
    bound = 1.0 / math.sqrt(fan_in)
    weight = jax.random.uniform(kw, (C, C, 3, 1), jnp.float32, -bound, bound)

    y = jax.jit(simple_tconv)(x, weight)
    jax.block_until_ready(y)

    # Pure-JAX reference with exact PyTorch Conv2d semantics.
    ref = jax.lax.conv_general_dilated(
        x, weight, window_strides=(1, 1), padding=((1, 1), (0, 0)),
        dimension_numbers=("NCHW", "OIHW", "NCHW"),
        precision=jax.lax.Precision.HIGHEST)

    assert y.shape == ref.shape == (B, C, T, V), (y.shape, ref.shape)
    assert bool(jnp.all(jnp.isfinite(y)))
    err = float(jnp.max(jnp.abs(y - ref)))
    assert err < 1e-2, f"max |err| = {err}"
    print("KERNEL_OK")
</pallas_src>

<mosaic_0001>
module attributes {stable_mosaic.version = 11 : i64} {
  func.func @_tconv_kernel(%arg0: i32, %arg1: memref<1x64x32xf32, #tpu.memory_space<vmem>>, %arg2: memref<3x32x128xf32, #tpu.memory_space<vmem>>, %arg3: memref<1x64x128xf32, #tpu.memory_space<vmem>>) attributes {dimension_semantics = [#tpu.dimension_semantics<parallel>], iteration_bounds = array<i64: 2>, scalar_prefetch = 0 : i64, scratch_operands = 0 : i64, tpu.core_type = #tpu.core_type<tc>, window_params = [{transform_indices = @transform_0, window_bounds = array<i64: 1, 64, 32>}, {pipeline_mode = #tpu.pipeline_mode<synchronous>, transform_indices = @transform_1, window_bounds = array<i64: 3, 32, 128>}, {transform_indices = @transform_2, window_bounds = array<i64: 1, 64, 128>}]} {
    %c0 = arith.constant 0 : index
    %c0_0 = arith.constant 0 : index
    %c0_1 = arith.constant 0 : index
    %0 = vector.load %arg1[%c0, %c0_0, %c0_1] : memref<1x64x32xf32, #tpu.memory_space<vmem>>, vector<1x64x32xf32>
    %1 = vector.shape_cast %0 : vector<1x64x32xf32> to vector<64x32xf32>
    %cst = arith.constant 0.000000e+00 : f32
    %2 = vector.broadcast %cst : f32 to vector<1x32xf32>
    %3 = vector.extract_strided_slice %1 {offsets = [0, 0], sizes = [63, 32], strides = [1, 1]} : vector<64x32xf32> to vector<63x32xf32>
    %4 = tpu.concatenate %2, %3 in 0 : vector<1x32xf32>, vector<63x32xf32> -> vector<64x32xf32>
    %5 = vector.extract_strided_slice %1 {offsets = [1, 0], sizes = [63, 32], strides = [1, 1]} : vector<64x32xf32> to vector<63x32xf32>
    %6 = tpu.concatenate %5, %2 in 0 : vector<63x32xf32>, vector<1x32xf32> -> vector<64x32xf32>
    %7 = tpu.iota {dimensions = array<i32: 0>} : vector<64x32xi32>
    %c16_i32 = arith.constant 16 : i32
    %c0_i32 = arith.constant 0 : i32
    %8 = arith.cmpi eq, %c16_i32, %c0_i32 : i32
    %c1_i32 = arith.constant 1 : i32
    %9 = arith.select %8, %c1_i32, %c16_i32 : i32
    %10 = vector.broadcast %9 : i32 to vector<64x32xi32>
    %11 = arith.remsi %7, %10 : vector<64x32xi32>
    %c0_i32_2 = arith.constant 0 : i32
    %12 = vector.broadcast %c0_i32_2 : i32 to vector<64x32xi32>
    %13 = arith.cmpi ne, %11, %12 : vector<64x32xi32>
    %c0_i32_3 = arith.constant 0 : i32
    %14 = vector.broadcast %c0_i32_3 : i32 to vector<64x32xi32>
    %15 = arith.cmpi slt, %11, %14 : vector<64x32xi32>
    %c0_i32_4 = arith.constant 0 : i32
    %16 = arith.cmpi slt, %9, %c0_i32_4 : i32
    %17 = vector.broadcast %16 : i1 to vector<64x32xi1>
    %18 = vector.broadcast %17 : vector<64x32xi1> to vector<64x32xi1>
    %19 = arith.xori %15, %18 : vector<64x32xi1>
    %20 = arith.andi %19, %13 : vector<64x32xi1>
    %21 = vector.broadcast %9 : i32 to vector<64x32xi32>
    %22 = arith.addi %11, %21 : vector<64x32xi32>
    %23 = arith.select %20, %22, %11 : vector<64x32xi1>, vector<64x32xi32>
    %c0_i32_5 = arith.constant 0 : i32
    %24 = vector.broadcast %c0_i32_5 : i32 to vector<64x32xi32>
    %25 = arith.cmpi eq, %23, %24 : vector<64x32xi32>
    %cst_6 = arith.constant 0.000000e+00 : f32
    %26 = vector.broadcast %cst_6 : f32 to vector<64x32xf32>
    %27 = arith.select %25, %26, %4 : vector<64x32xi1>, vector<64x32xf32>
    %c15_i32 = arith.constant 15 : i32
    %28 = vector.broadcast %c15_i32 : i32 to vector<64x32xi32>
    %29 = arith.cmpi eq, %23, %28 : vector<64x32xi32>
    %cst_7 = arith.constant 0.000000e+00 : f32
    %30 = vector.broadcast %cst_7 : f32 to vector<64x32xf32>
    %31 = arith.select %29, %30, %6 : vector<64x32xi1>, vector<64x32xf32>
    %c0_8 = arith.constant 0 : index
    %c0_9 = arith.constant 0 : index
    %c0_10 = arith.constant 0 : index
    %32 = vector.load %arg2[%c0_8, %c0_9, %c0_10] : memref<3x32x128xf32, #tpu.memory_space<vmem>>, vector<1x32x128xf32>
    %33 = vector.shape_cast %32 : vector<1x32x128xf32> to vector<32x128xf32>
    %cst_11 = arith.constant dense<0.000000e+00> : vector<64x128xf32>
    %34 = tpu.matmul %27, %33, %cst_11 {dimension_numbers = #tpu.dot_dimension_numbers<[1], [0], [0], [1], [0, 0, 1, 1], [], []>} : vector<64x32xf32>, vector<32x128xf32>, vector<64x128xf32> -> vector<64x128xf32>
    %c1 = arith.constant 1 : index
    %c0_12 = arith.constant 0 : index
    %c0_13 = arith.constant 0 : index
    %35 = vector.load %arg2[%c1, %c0_12, %c0_13] : memref<3x32x128xf32, #tpu.memory_space<vmem>>, vector<1x32x128xf32>
    %36 = vector.shape_cast %35 : vector<1x32x128xf32> to vector<32x128xf32>
    %cst_14 = arith.constant dense<0.000000e+00> : vector<64x128xf32>
    %37 = tpu.matmul %1, %36, %cst_14 {dimension_numbers = #tpu.dot_dimension_numbers<[1], [0], [0], [1], [0, 0, 1, 1], [], []>} : vector<64x32xf32>, vector<32x128xf32>, vector<64x128xf32> -> vector<64x128xf32>
    %38 = arith.addf %34, %37 : vector<64x128xf32>
    %c2 = arith.constant 2 : index
    %c0_15 = arith.constant 0 : index
    %c0_16 = arith.constant 0 : index
    %39 = vector.load %arg2[%c2, %c0_15, %c0_16] : memref<3x32x128xf32, #tpu.memory_space<vmem>>, vector<1x32x128xf32>
    %40 = vector.shape_cast %39 : vector<1x32x128xf32> to vector<32x128xf32>
    %cst_17 = arith.constant dense<0.000000e+00> : vector<64x128xf32>
    %41 = tpu.matmul %31, %40, %cst_17 {dimension_numbers = #tpu.dot_dimension_numbers<[1], [0], [0], [1], [0, 0, 1, 1], [], []>} : vector<64x32xf32>, vector<32x128xf32>, vector<64x128xf32> -> vector<64x128xf32>
    %42 = arith.addf %38, %41 : vector<64x128xf32>
    %c0_18 = arith.constant 0 : index
    %c0_19 = arith.constant 0 : index
    %c0_20 = arith.constant 0 : index
    %43 = vector.load %arg3[%c0_18, %c0_19, %c0_20] : memref<1x64x128xf32, #tpu.memory_space<vmem>>, vector<1x64x128xf32>
    %44 = vector.shape_cast %43 : vector<1x64x128xf32> to vector<64x128xf32>
    %45 = vector.shape_cast %42 : vector<64x128xf32> to vector<1x64x128xf32>
    tpu.vector_store %arg3[%c0_18, %c0_19, %c0_20], %45 {strides = array<i32>} : memref<1x64x128xf32, #tpu.memory_space<vmem>>, vector<1x64x128xf32>,
    return
  }
  func.func @transform_0(%arg0: i32) -> (i32, i32, i32) {
    %c0_i32 = arith.constant 0 : i32
    %c0_i32_0 = arith.constant 0 : i32
    %c0_i32_1 = arith.constant 0 : i32
    return %arg0, %c0_i32, %c0_i32_0 : i32, i32, i32
  }
  func.func @transform_1(%arg0: i32) -> (i32, i32, i32) {
    %c0_i32 = arith.constant 0 : i32
    %c0_i32_0 = arith.constant 0 : i32
    %c0_i32_1 = arith.constant 0 : i32
    %c0_i32_2 = arith.constant 0 : i32
    return %c0_i32, %c0_i32_0, %c0_i32_1 : i32, i32, i32
  }
  func.func @transform_2(%arg0: i32) -> (i32, i32, i32) {
    %c0_i32 = arith.constant 0 : i32
    %c0_i32_0 = arith.constant 0 : i32
    %c0_i32_1 = arith.constant 0 : i32
    return %arg0, %c0_i32, %c0_i32_0 : i32, i32, i32
  }
}

</mosaic_0001>

<bundles_post_ra>
// kernel: simple_tconv.1
= control target key start
LH: loop header
LB: loop body
LE: loop exit
PB: predicated region body
PF: predicated region fallthrough
CT: control target
= control target key end

     0   :  { %s708_s9 = smov 0   ;;  %s884_s0 = inlined_call_operand.vmem [shape: f32[2,64,32], index: 0, kind: input, shape index: {}]   ;;  %s885_s1 = inlined_call_operand.vmem [shape: f32[3,32,128], index: 1, kind: input, shape index: {}]   ;;  %s886_s2 = inlined_call_operand.vmem [shape: f32[2,64,128], index: 2, kind: output, shape index: {}]  }
   0x1 LB: > { %s620_s10 = sadd.s32 4294967295, %s691_s9   ;;  %p624_p0 = scmp.ge.s32.totalorder %s691_s9, 1  ;;  %s691_s9 = sphi %s708_s9, %s12_s9  }
   0x2   : > { %p112_p1 = scmp.lt.s32.totalorder %s691_s9, 3 }
   0x4   : > { %p113_p2 = pnand %p624_p0, %p112_p1 }
   0x5   : > { %p134_p3 = scmp.lt.s32.totalorder (!%p113_p2), %s620_s10, 1 }
   0x6   : > { %116 = sbr.rel (%p113_p2) target bundleno = 196 (0xc4), region = 28 }
   0xb   : > { %v632_v0 = vld [vmem:[%s885_s1 + $0x38] sm:$0xff]  ;;  %v631_v1 = vld [vmem:[%s885_s1 + $0x30] sm:$0xff]  ;;  %v210_v3 = vlaneseq  ;;  %v630_v5 = vld [vmem:[%s885_s1 + $0x28] sm:$0xff]  ;;  %s890_s10 = smov (!%p134_p3, %s620_s10), 1  ;;  %vm356_vm0 = vcmask 261120   ;;  %vm185_vm1 = vcmask 1046528  }
   0xc   : > { %v725_v2 = vld [vmem:[%s885_s1 + $0x58] sm:$0xff]  ;;  %665 = vmatpush.msra.mxu3 %v632_v0  ;;  %v731_v4 = vld [vmem:[%s885_s1 + $0x50] sm:$0xff]  ;;  %385 = vmatpush.msra.mxu0 %v632_v0  ;;  %v742_v7 = vld [vmem:[%s885_s1 + $0x48] sm:$0xff]  ;;  %s663_s29 = sshll.u32 %s890_s10, 6  ;;  %vm160_vm2 = vcmask 1040384  }
   0xd   : > { %520 = vmatpush.msra.mxu2 %v725_v2  ;;  %v350_v6 = vld [vmem:[%s885_s1 + $0x18] sm:$0xff]  ;;  %v746_v8 = vshrl.u32 %v210_v3, 7  ;;  %v349_v9 = vld [vmem:[%s885_s1 + $0x10] sm:$0xff]  ;;  %v629_v10 = vld [vmem:[%s885_s1 + $0x20] sm:$0xff]  ;;  %s769_s6 = scalar_lea.vmem %s884_s0, %s663_s29  ;;  %s871_s15 = scalar_lea.vmem %s886_s2, %s663_s29 }
   0xe   : > { %666 = vmatpush.msra.mxu3 %v631_v1  ;;  %450 = vmatpush.msra.mxu1 %v350_v6  ;;  %v759_v11 = vld [vmem:[%s885_s1 + $0x40] sm:$0xff]  ;;  %v348_v14 = vld [vmem:[%s885_s1 + $0x8] sm:$0xff]  ;;  %v775_v15 = vld [vmem:[%s769_s6 + $0x30] sm:$0xff] }
   0xf   : > { %521 = vmatpush.msra.mxu2 %v731_v4  ;;  %386 = vmatpush.msra.mxu0 %v631_v1  ;;  %v223_v12 = vand.u32 15, %v746_v8  ;;  %v212_v13 = vadd.s32 8, %v746_v8  ;;  %v144_v16 = vld [vmem:[%s769_s6] sm:$0xff]  ;;  %v145_v17 = vld [vmem:[%s769_s6 + $0x8] sm:$0xff]  ;;  %v784_v21 = vld [vmem:[%s769_s6 + $0x10] sm:$0xff]  ;;  %v217_v27 = vadd.s32 48, %v746_v8 }
  0x10   : > { %667 = vmatpush.msra.mxu3 %v630_v5  ;;  %451 = vmatpush.msra.mxu1 %v349_v9  ;;  %v186_v18 = vrot.slane %v144_v16, 1  ;;  %v187_v19 = vrot.slane %v145_v17, 1  ;;  %v347_v20 = vld [vmem:[%s885_s1] sm:$0xff]  ;;  %v161_v22 = vrot.slane %v144_v16, 7  ;;  %v189_v23 = vrot.slane %v784_v21, 1  ;;  %v795_v29 = vld [vmem:[%s769_s6 + $0x28] sm:$0xff] }
  0x11   : > { %522 = vmatpush.msra.mxu2 %v742_v7  ;;  %387 = vmatpush.msra.mxu0 %v630_v5  ;;  %vm315_vm3 = vcmp.eq.s32.totalorder %v223_v12, 0  ;;  %v230_v24 = vand.u32 15, %v212_v13  ;;  %v800_v31 = vld [vmem:[%s769_s6 + $0x38] sm:$0xff]  ;;  %v162_v32 = vrot.slane %v145_v17, 7  ;;  %v172_v33 = vrot.slane %v775_v15, 7  ;;  %v148_v47 = vld [vmem:[%s769_s6 + $0x20] sm:$0xff] }
  0x12   : > { %668 = vmatpush.msra.mxu3 %v629_v10  ;;  %452 = vmatpush.msra.mxu1 %v348_v14  ;;  %v188_v25 = vsel %vm185_vm1, %v186_v18, %v187_v19  ;;  %v184_v26 = vsel %vm160_vm2, 0.0, %v161_v22  ;;  %v190_v30 = vsel %vm185_vm1, %v187_v19, %v189_v23  ;;  %v170_v34 = vrot.slane %v795_v29, 7  ;;  %v147_v38 = vld [vmem:[%s769_s6 + $0x18] sm:$0xff] }
  0x13   : > { %523 = vmatpush.msra.mxu2 %v759_v11  ;;  %639 = vmatmul.msk.f32.vlgmr.msra.gmra.mxu3 %vm356_vm0, %v775_v15  ;;  %v323_v28 = vsel %vm315_vm3, 0.0, %v184_v26  ;;  %vm332_vm4 = vcmp.eq.s32.totalorder %v230_v24, 15  ;;  %v265_v35 = vand.u32 15, %v217_v27  ;;  %v213_v36 = vadd.s32 16, %v746_v8 }
  0x14   : > { %669 = vmatpush.msrb.mxu3 %v350_v6  ;;  %388 = vmatpush.msra.mxu0 %v629_v10  ;;  %v340_v37 = vsel %vm332_vm4, 0.0, %v190_v30  ;;  %v163_v39 = vsel %vm160_vm2, %v161_v22, %v162_v32  ;;  %v173_v40 = vsel %vm160_vm2, %v170_v34, %v172_v33  ;;  %v164_v42 = vrot.slane %v784_v21, 7 }
  0x15   : > { %653 = vmatmul.msk.f32.vlgmr.msra.gmra.mxu2 %vm356_vm0, %v188_v25  ;;  %453 = vmatpush.msra.mxu1 %v347_v20  ;;  %vm814_vm5 = vcmp.eq.s32.totalorder %v265_v35, 0  ;;  %v237_v43 = vand.u32 15, %v213_v36  ;;  %v191_v44 = vrot.slane %v147_v38, 1  ;;  %v214_v45 = vadd.s32 24, %v746_v8 }
  0x16   : > { %633 = vmatmul.msk.f32.vlgmr.msra.gmra.mxu0 %vm356_vm0, %v144_v16  ;;  %670 = vmatpush.msrb.mxu3 %v349_v9  ;;  %v329_v46 = vsel %vm814_vm5, 0.0, %v173_v40  ;;  %v165_v48 = vsel %vm160_vm2, %v162_v32, %v164_v42  ;;  %v193_v50 = vrot.slane %v148_v47, 1  ;;  %v174_v52 = vrot.slane %v800_v31, 7 }
  0x17   : > { %641 = vmatmul.msk.f32.vlgmr.msra.gmra.mxu1 %vm356_vm0, %v323_v28  ;;  %vm317_vm6 = vcmp.eq.s32.totalorder %v237_v43, 0  ;;  %v192_v49 = vsel %vm185_vm1, %v189_v23, %v191_v44  ;;  %v244_v51 = vand.u32 15, %v214_v45  ;;  %v166_v56 = vrot.slane %v147_v38, 7 }
  0x18   : > { %671 = vmatpush.msrb.mxu3 %v348_v14  ;;  %v325_v53 = vsel %vm317_vm6, 0.0, %v165_v48  ;;  %v194_v54 = vsel %vm185_vm1, %v191_v44, %v193_v50  ;;  %v175_v55 = vsel %vm160_vm2, %v172_v33, %v174_v52  ;;  %v215_v57 = vadd.s32 32, %v746_v8 }
  0x19   : > { %vm334_vm7 = vcmp.eq.s32.totalorder %v244_v51, 15  ;;  %v197_v59 = vrot.slane %v775_v15, 1  ;;  %v199_v60 = vrot.slane %v800_v31, 1  ;;  %v167_v61 = vsel %vm160_vm2, %v164_v42, %v166_v56 }
  0x1a   : > { %672 = vmatpush.msrb.mxu3 %v347_v20  ;;  %v342_v58 = vsel %vm334_vm7, 0.0, %v194_v54  ;;  %v168_v62 = vrot.slane %v148_v47, 7  ;;  %v251_v63 = vand.u32 15, %v215_v57  ;;  %v218_v0 = vadd.s32 56, %v746_v8 }
  0x1b   : > { %640 = vmatmul.msk.f32.gmra.mxu3 %vm356_vm0, %v800_v31  ;;  %v195_v1 = vrot.slane %v795_v29, 1  ;;  %v200_v3 = vsel %vm185_vm1, %v197_v59, %v199_v60  ;;  %v209_v10 = vsel %vm185_vm1, %v199_v60, 0.0 }
  0x1c   : > { %673 = vmatpush.msra.mxu3 %v725_v2  ;;  %v216_v2 = vadd.s32 40, %v746_v8  ;;  %vm319_vm8 = vcmp.eq.s32.totalorder %v251_v63, 0  ;;  %v272_v5 = vand.u32 15, %v218_v0  ;;  %v171_v13 = vsel %vm160_vm2, %v168_v62, %v170_v34 }
  0x1d   : > { %654 = vmatmul.msk.f32.gmra.mxu2 %vm356_vm0, %v340_v37  ;;  %v196_v6 = vsel %vm185_vm1, %v193_v50, %v195_v1  ;;  %v198_v8 = vsel %vm185_vm1, %v195_v1, %v197_v59 }
  0x1e   : > { %634 = vmatmul.msk.f32.gmra.mxu0 %vm356_vm0, %v145_v17  ;;  %674 = vmatpush.msra.mxu3 %v731_v4  ;;  %v169_v4 = vsel %vm160_vm2, %v166_v56, %v168_v62  ;;  %vm338_vm9 = vcmp.eq.s32.totalorder %v272_v5, 15 }
  0x1f   : > { %642 = vmatmul.msk.f32.gmra.mxu1 %vm356_vm0, %v163_v39  ;;  %v327_v9 = vsel %vm319_vm8, 0.0, %v169_v4 }
  0x20   : > { %675 = vmatpush.msra.mxu3 %v742_v7  ;;  %v258_v7 = vand.u32 15, %v216_v2 }
  0x22   : > { %676 = vmatpush.msra.mxu3 %v759_v11  ;;  %vm336_vm10 = vcmp.eq.s32.totalorder %v258_v7, 15  ;;  %v346_v11 = vsel %vm338_vm9, 0.0, %v209_v10 }
  0x23   : > { %647 = vmatmul.msk.f32.vlgmr.msrb.gmra.mxu3 %vm356_vm0, %v329_v46  ;;  %v344_v12 = vsel %vm336_vm10, 0.0, %v198_v8 }
  0x25   : > { %655 = vmatmul.msk.f32.gmra.mxu2 %vm356_vm0, %v192_v49 }
  0x26   : > { %635 = vmatmul.msk.f32.gmra.mxu0 %vm356_vm0, %v784_v21 }
  0x27   : > { %643 = vmatmul.msk.f32.gmra.mxu1 %vm356_vm0, %v325_v53 }
  0x2b   : > { %648 = vmatmul.msk.f32.gmra.mxu3 %vm356_vm0, %v175_v55 }
  0x2d   : > { %656 = vmatmul.msk.f32.gmra.mxu2 %vm356_vm0, %v342_v58 }
  0x2e   : > { %636 = vmatmul.msk.f32.gmra.mxu0 %vm356_vm0, %v147_v38 }
  0x2f   : > { %644 = vmatmul.msk.f32.gmra.mxu1 %vm356_vm0, %v167_v61 }
  0x33   : > { %659 = vmatmul.msk.f32.vlgmr.msra.gmra.mxu3 %vm356_vm0, %v200_v3 }
  0x35   : > { %657 = vmatmul.msk.f32.gmra.mxu2 %vm356_vm0, %v196_v6 }
  0x36   : > { %637 = vmatmul.msk.f32.gmra.mxu0 %vm356_vm0, %v148_v47 }
  0x37   : > { %645 = vmatmul.msk.f32.gmra.mxu1 %vm356_vm0, %v327_v9 }
  0x3b   : > { %660 = vmatmul.msk.f32.gmra.mxu3 %vm356_vm0, %v346_v11 }
  0x3d   : > { %658 = vmatmul.msk.f32.gmra.mxu2 %vm356_vm0, %v344_v12 }
  0x3e   : > { %638 = vmatmul.msk.f32.gmra.mxu0 %vm356_vm0, %v795_v29 }
  0x3f   : > { %646 = vmatmul.msk.f32.gmra.mxu1 %vm356_vm0, %v171_v13 }
  0x93   : > { %v390_v14 = vpop.f32.mrf.mxu0 }
  0x94   : > { %v455_v15 = vpop.f32.mrf.mxu1 }
  0x95   : > { %v456_v16 = vadd.f32 %v455_v15, %v390_v14 }
  0x96   : > { %v408_v17 = vpop.f32.mrf.mxu3 }
  0x98   : > { %v525_v18 = vpop.f32.mrf.mxu2 }
  0x99   : > { %v549_v19 = vadd.f32 %v525_v18, %v456_v16 }
  0x9b   : > { %557 = vst [vmem:[%s871_s15] sm:$0xff] %v549_v19  ;;  %v393_v20 = vpop.f32.mrf.mxu0 }
  0x9c   : > { %v458_v21 = vpop.f32.mrf.mxu1 }
  0x9d   : > { %v459_v22 = vadd.f32 %v458_v21, %v393_v20 }
  0x9e   : > { %v411_v23 = vpop.f32.mrf.mxu3 }
  0xa0   : > { %v528_v24 = vpop.f32.mrf.mxu2 }
  0xa1   : > { %v550_v25 = vadd.f32 %v528_v24, %v459_v22 }
  0xa3   : > { %558 = vst [vmem:[%s871_s15 + $0x8] sm:$0xff] %v550_v25  ;;  %v396_v26 = vpop.f32.mrf.mxu0 }
  0xa4   : > { %v461_v27 = vpop.f32.mrf.mxu1 }
  0xa5   : > { %v462_v28 = vadd.f32 %v461_v27, %v396_v26 }
  0xa6   : > { %v473_v29 = vpop.f32.mrf.mxu3 }
  0xa7   : > { %v474_v40 = vadd.f32 %v473_v29, %v408_v17 }
  0xa8   : > { %v531_v30 = vpop.f32.mrf.mxu2 }
  0xa9   : > { %v551_v31 = vadd.f32 %v531_v30, %v462_v28 }
  0xab   : > { %559 = vst [vmem:[%s871_s15 + $0x10] sm:$0xff] %v551_v31  ;;  %v399_v32 = vpop.f32.mrf.mxu0 }
  0xac   : > { %v464_v33 = vpop.f32.mrf.mxu1 }
  0xad   : > { %v465_v34 = vadd.f32 %v464_v33, %v399_v32 }
  0xae   : > { %v476_v35 = vpop.f32.mrf.mxu3 }
  0xaf   : > { %v477_v48 = vadd.f32 %v476_v35, %v411_v23 }
  0xb0   : > { %v534_v36 = vpop.f32.mrf.mxu2 }
  0xb1   : > { %v552_v37 = vadd.f32 %v534_v36, %v465_v34 }
  0xb3   : > { %560 = vst [vmem:[%s871_s15 + $0x18] sm:$0xff] %v552_v37  ;;  %v402_v38 = vpop.f32.mrf.mxu0 }
  0xb4   : > { %v467_v39 = vpop.f32.mrf.mxu1 }
  0xb5   : > { %v468_v41 = vadd.f32 %v467_v39, %v402_v38 }
  0xb6   : > { %v543_v42 = vpop.f32.mrf.mxu3 }
  0xb7   : > { %v555_v43 = vadd.f32 %v543_v42, %v474_v40 }
  0xb8   : > { %v537_v44 = vpop.f32.mrf.mxu2 }
  0xb9   : > { %563 = vst [vmem:[%s871_s15 + $0x30] sm:$0xff] %v555_v43  ;;  %v553_v45 = vadd.f32 %v537_v44, %v468_v41 }
  0xbb   : > { %561 = vst [vmem:[%s871_s15 + $0x20] sm:$0xff] %v553_v45  ;;  %v405_v46 = vpop.f32.mrf.mxu0 }
  0xbc   : > { %v470_v47 = vpop.f32.mrf.mxu1 }
  0xbd   : > { %v471_v49 = vadd.f32 %v470_v47, %v405_v46 }
  0xbe   : > { %v546_v50 = vpop.f32.mrf.mxu3 }
  0xbf   : > { %v556_v51 = vadd.f32 %v546_v50, %v477_v48 }
  0xc0   : > { %v540_v52 = vpop.f32.mrf.mxu2 }
  0xc1   : > { %564 = vst [vmem:[%s871_s15 + $0x38] sm:$0xff] %v556_v51  ;;  %v554_v53 = vadd.f32 %v540_v52, %v471_v49 }
  0xc3   : > { %562 = vst [vmem:[%s871_s15 + $0x28] sm:$0xff] %v554_v53 }
  0xc4 PF: > { %s12_s9 = sadd.s32 1, %s691_s9  }
  0xc5   : > { %p9_p4 = scmp.ge.s32.totalorder %s12_s9, 4  }
  0xc7   :  { %11 = sbr.rel (!%p9_p4) target bundleno = 1 (0x1), region = 60 }

</bundles_post_ra>
